<compile_context>
chip_gen: v5e
topology: v5e:2x2
jax: 0.10.0
libtpu: 0.0.40
codegen_flags: <defaults>
</compile_context>

<pallas_src>
import functools

import jax
import jax.numpy as jnp
from jax import lax
from jax.experimental import pallas as pl
from jax.experimental.pallas import tpu as pltpu


def _round_up(x, m):
    return ((x + m - 1) // m) * m


def _pick_chunk(hw, max_chunk):
    """Largest divisor of hw that is <= max_chunk, preferring multiples of 128."""
    max_chunk = max(1, min(hw, max_chunk))
    best, best128 = 1, 0
    for c in range(1, max_chunk + 1):
        if hw % c == 0:
            best = c
            if c % 128 == 0:
                best128 = c
    return best128 if best128 else best


def _conv_relu_pool_chunk(x_ref, wc0, wc1, wc2, bias_b, base, chunk, w):
    """3x3 'same' conv + bias + ReLU on `chunk` pixels -> (C_PAD, 1) partial pool sum.

    The wrapper folded the 3 dw taps into K via a 1-D im2col along W, so only the
    3 dh row taps remain; each is a lane-offset slice (0, W, 2W) of the resident
    image feeding one MXU matmul.  The accumulator starts from the broadcast
    conv bias + the first dot (no zeros init, no separate bias add pass).
    """
    acc = bias_b + jnp.dot(wc0, x_ref[:, pl.ds(base, chunk)],
                           preferred_element_type=jnp.float32)
    acc = acc + jnp.dot(wc1, x_ref[:, pl.ds(base + w, chunk)],
                        preferred_element_type=jnp.float32)
    acc = acc + jnp.dot(wc2, x_ref[:, pl.ds(base + 2 * w, chunk)],
                        preferred_element_type=jnp.float32)
    feat = jnp.maximum(acc, 0.0)                      # bias already folded in
    return jnp.sum(feat, axis=1, keepdims=True)       # cross-lane (XLU) partial sum


# ----------------------------------------------------------------------------
# Fused kernel: 3x3 conv (transposed, lane-dense) + bias + ReLU
#               + global average pool (chunked over pixels)
#               + final Linear, all per grid step (one image per step).
# ----------------------------------------------------------------------------
def _fused_conv_pool_fc_kernel(x_ref, wc_ref, bc_ref, wf_ref, bf_ref, o_ref,
                               *, w, hw, chunk, inv_hw):
    # x_ref : (K, (H+2)*W)      bf16  padded, W-im2col'd image; K on sublanes,
    #                                 pixels on the lane axis (lane-dense).
    # wc_ref: (3, C_PAD, K)     bf16  transposed conv weight, one (C_PAD, K) per dh.
    # bc_ref: (C_PAD, 1)        f32   conv bias column.
    # wf_ref: (OUT_PAD, C_PAD)  f32   fc weight (out x features).
    # bf_ref: (OUT_PAD, 1)      f32   fc bias column.
    # o_ref : (OUT_PAD, 1)      f32   per-image output column (tiny store).
    c_pad = wc_ref.shape[1]
    n_chunks = hw // chunk

    # Hoisted once per grid step (not per chunk): weight taps + lane-broadcast bias.
    wc0, wc1, wc2 = wc_ref[0], wc_ref[1], wc_ref[2]
    bias_b = jnp.broadcast_to(bc_ref[...], (c_pad, chunk))

    if n_chunks <= 8:
        # Static chunk starts -> tap slices are compile-time-constant lane windows.
        pool = jnp.zeros((c_pad, 1), jnp.float32)
        for ci in range(n_chunks):
            pool = pool + _conv_relu_pool_chunk(
                x_ref, wc0, wc1, wc2, bias_b, ci * chunk, chunk, w)
    else:
        # Large images: rolled loop keeps code size bounded; chunk (and, at real
        # RANZCR resolutions, W) is a multiple of 128 so tap starts stay aligned.
        def body(ci, pool):
            base = pl.multiple_of(ci * chunk, chunk)
            return pool + _conv_relu_pool_chunk(
                x_ref, wc0, wc1, wc2, bias_b, base, chunk, w)

        pool = lax.fori_loop(0, n_chunks, body,
                             jnp.zeros((c_pad, 1), jnp.float32))

    pooled = pool * inv_hw                            # AdaptiveAvgPool2d(1)
    o_ref[...] = (jnp.dot(wf_ref[...], pooled,
                          preferred_element_type=jnp.float32) + bf_ref[...])


def fused_conv_pool_fc(x_nchw, stem_w, stem_b, fc_w_t, fc_b, *,
                       max_chunk_pixels=2048):
    """x (B, Cin, H, W) -> (B, out_dim): 3x3 'same' conv + ReLU + GAP + Linear."""
    B, Cin, H, W = x_nchw.shape
    F = stem_w.shape[-1]
    out_dim = fc_w_t.shape[-1]
    K = 3 * Cin                      # contraction dim: (dw, cin)
    HPW = (H + 2) * W                # pixels per padded, W-im2col'd image
    C_PAD = _round_up(F, 128)
    OUT_PAD = _round_up(out_dim, 128)
    chunk = _pick_chunk(H * W, max_chunk_pixels)

    # ---- glue (XLA): bf16 cast FIRST, then pad + 1-D im2col along W only -----
    # NCHW is already channels-major for the transposed layout: no transpose,
    # no overlapping-window stack, no halo duplication (only +2 zero rows).
    xb = x_nchw.astype(jnp.bfloat16)
    xp = jnp.pad(xb, ((0, 0), (0, 0), (1, 1), (1, 1)))              # (B,Cin,H+2,W+2)
    xw = jnp.concatenate([xp[:, :, :, dw:dw + W] for dw in range(3)],
                         axis=1)                                    # (B,K,H+2,W), k = dw*Cin+cin
    xw = xw.reshape(B, K, HPW)

    # ---- weights: transposed for the lane-dense layout, channel-padded -------
    wc = jnp.transpose(stem_w.reshape(3, K, F), (0, 2, 1))          # (3, F, K)
    wc = jnp.pad(wc, ((0, 0), (0, C_PAD - F), (0, 0))).astype(jnp.bfloat16)
    bc = jnp.pad(stem_b, (0, C_PAD - F)).reshape(C_PAD, 1).astype(jnp.float32)
    wf = jnp.pad(fc_w_t.T, ((0, OUT_PAD - out_dim), (0, C_PAD - F))
                 ).astype(jnp.float32)                              # (OUT_PAD, C_PAD)
    bf = jnp.pad(fc_b, (0, OUT_PAD - out_dim)).reshape(OUT_PAD, 1).astype(jnp.float32)

    kernel = functools.partial(_fused_conv_pool_fc_kernel,
                               w=W, hw=H * W, chunk=chunk,
                               inv_hw=1.0 / float(H * W))

    # VMEM budget from the lane-padded footprint: double-buffered image +
    # resident weights + chunked f32 intermediates; capped at 48 MiB so the same
    # kernel also fits v7x's 64 MiB/TC (raise toward 96 MiB on v5e/v6e if needed).
    in_bytes = 2 * _round_up(K, 16) * _round_up(HPW, 128) * 2
    wt_bytes = 2 * (3 * C_PAD * 128 * 2 + (C_PAD + OUT_PAD) * 128 * 4
                    + OUT_PAD * C_PAD * 4)
    inter_bytes = 6 * C_PAD * _round_up(chunk, 128) * 4
    vmem_limit = int(min(max(1.25 * (in_bytes + wt_bytes + inter_bytes)
                             + (2 << 20), 32 << 20), 48 << 20))

    out_col = pl.pallas_call(
        kernel,
        out_shape=jax.ShapeDtypeStruct((B, OUT_PAD, 1), jnp.float32),
        grid=(B,),
        in_specs=[
            # Whole padded image per grid step, double-buffered across images by
            # the BlockSpec pipeline (lane-dense DMA: pixels on the lane axis).
            pl.BlockSpec((None, K, HPW), lambda b: (b, 0, 0)),
            # Resident conv/fc weights & biases (constant index maps).
            pl.BlockSpec((3, C_PAD, K), lambda b: (0, 0, 0)),
            pl.BlockSpec((C_PAD, 1), lambda b: (0, 0)),
            pl.BlockSpec((OUT_PAD, C_PAD), lambda b: (0, 0)),
            pl.BlockSpec((OUT_PAD, 1), lambda b: (0, 0)),
        ],
        out_specs=pl.BlockSpec((None, OUT_PAD, 1), lambda b: (b, 0, 0)),
        compiler_params=pltpu.CompilerParams(
            # Batch axis "parallel" -> megacore sharding on v7x.  (With B == 1
            # one TensorCore idles; split the pixel-chunk loop onto a second
            # parallel grid axis if single-image v7x latency ever matters.)
            dimension_semantics=("parallel",),
            vmem_limit_bytes=vmem_limit,
        ),
    )(xw, wc, bc, wf, bf)

    return out_col.reshape(B, OUT_PAD)[:, :out_dim]


# ----------------------------------------------------------------------------
# Full forward, matching RANZCRResNet200D.forward semantics.
# ----------------------------------------------------------------------------
@functools.partial(jax.jit, static_argnames=("max_chunk_pixels",))
def ranzcr_resnet200d_forward(x_nchw, params, *, max_chunk_pixels=2048):
    return fused_conv_pool_fc(
        x_nchw.astype(jnp.float32), params["stem_w"], params["stem_b"],
        params["fc_w_t"], params["fc_b"], max_chunk_pixels=max_chunk_pixels)


def init_params(key, in_ch, n_features, out_dim):
    k1, k2, k3, k4 = jax.random.split(key, 4)
    stem_w = jax.random.normal(k1, (3, 3, in_ch, n_features), jnp.float32) * 0.05
    stem_b = jax.random.normal(k2, (n_features,), jnp.float32) * 0.01
    fc_w_t = jax.random.normal(k3, (n_features, out_dim), jnp.float32) * 0.05
    fc_b = jax.random.normal(k4, (out_dim,), jnp.float32) * 0.01
    return {"stem_w": stem_w, "stem_b": stem_b, "fc_w_t": fc_w_t, "fc_b": fc_b}


if __name__ == "__main__":
    # Small shapes consistent with the module's forward:
    #   x: (batch=2, channels=4, H=16, W=16), n_features=64, out_dim=11
    B, Cin, H, W = 2, 4, 16, 16
    N_FEATURES, OUT_DIM = 64, 11

    key = jax.random.PRNGKey(0)
    kx, kp = jax.random.split(key)
    x = jax.random.normal(kx, (B, Cin, H, W), jnp.float32)
    params = init_params(kp, Cin, N_FEATURES, OUT_DIM)

    # max_chunk_pixels=128 -> 2 pixel chunks per image, exercising the chunked
    # conv/pool epilogue even at demo shapes.
    out = ranzcr_resnet200d_forward(x, params, max_chunk_pixels=128)
    out = jax.block_until_ready(out)
    assert out.shape == (B, OUT_DIM), out.shape

    # --- reference 1: same math as the kernel (bf16 conv inputs, f32 acc) ----
    x_nhwc = jnp.transpose(x, (0, 2, 3, 1))
    xp = jnp.pad(x_nhwc, ((0, 0), (1, 1), (1, 1), (0, 0)))
    acc = jnp.zeros((B, H, W, N_FEATURES), jnp.float32)
    for dh in range(3):
        for dw in range(3):
            tap = xp[:, dh:dh + H, dw:dw + W, :].astype(jnp.bfloat16)
            wtap = params["stem_w"][dh, dw].astype(jnp.bfloat16)
            acc = acc + jnp.einsum("bhwc,cf->bhwf", tap, wtap,
                                   preferred_element_type=jnp.float32)
    feat = jnp.maximum(acc + params["stem_b"], 0.0)
    pooled = jnp.mean(feat, axis=(1, 2))
    ref_bf16 = jnp.dot(pooled, params["fc_w_t"],
                       precision=jax.lax.Precision.HIGHEST) + params["fc_b"]
    assert jnp.allclose(out, ref_bf16, atol=3e-3, rtol=1e-2), (
        jnp.max(jnp.abs(out - ref_bf16)))

    # --- reference 2: full-f32 conv (semantic sanity, loose tolerance) -------
    feats32 = lax.conv_general_dilated(
        x_nhwc, params["stem_w"], window_strides=(1, 1), padding="SAME",
        dimension_numbers=("NHWC", "HWIO", "NHWC"),
    ) + params["stem_b"]
    feats32 = jnp.maximum(feats32, 0.0)
    ref_f32 = jnp.mean(feats32, axis=(1, 2)) @ params["fc_w_t"] + params["fc_b"]
    assert jnp.allclose(out, ref_f32, atol=3e-2, rtol=3e-2), (
        jnp.max(jnp.abs(out - ref_f32)))

    print("KERNEL_OK")
</pallas_src>

<mosaic_0001>
module attributes {stable_mosaic.version = 11 : i64} {
  func.func @_fused_conv_pool_fc_kernel(%arg0: i32, %arg1: memref<1x12x288xbf16, #tpu.memory_space<vmem>>, %arg2: memref<3x128x12xbf16, #tpu.memory_space<vmem>>, %arg3: memref<128x1xf32, #tpu.memory_space<vmem>>, %arg4: memref<128x128xf32, #tpu.memory_space<vmem>>, %arg5: memref<128x1xf32, #tpu.memory_space<vmem>>, %arg6: memref<1x128x1xf32, #tpu.memory_space<vmem>>) attributes {dimension_semantics = [#tpu.dimension_semantics<parallel>], iteration_bounds = array<i64: 2>, scalar_prefetch = 0 : i64, scratch_operands = 0 : i64, tpu.core_type = #tpu.core_type<tc>, window_params = [{transform_indices = @transform_0, window_bounds = array<i64: 1, 12, 288>}, {pipeline_mode = #tpu.pipeline_mode<synchronous>, transform_indices = @transform_1, window_bounds = array<i64: 3, 128, 12>}, {pipeline_mode = #tpu.pipeline_mode<synchronous>, transform_indices = @transform_2, window_bounds = array<i64: 128, 1>}, {pipeline_mode = #tpu.pipeline_mode<synchronous>, transform_indices = @transform_3, window_bounds = array<i64: 128, 128>}, {pipeline_mode = #tpu.pipeline_mode<synchronous>, transform_indices = @transform_4, window_bounds = array<i64: 128, 1>}, {transform_indices = @transform_5, window_bounds = array<i64: 1, 128, 1>}]} {
    %c0 = arith.constant 0 : index
    %c0_0 = arith.constant 0 : index
    %c0_1 = arith.constant 0 : index
    %0 = vector.load %arg2[%c0, %c0_0, %c0_1] : memref<3x128x12xbf16, #tpu.memory_space<vmem>>, vector<1x128x12xbf16>
    %1 = vector.shape_cast %0 : vector<1x128x12xbf16> to vector<128x12xbf16>
    %c1 = arith.constant 1 : index
    %c0_2 = arith.constant 0 : index
    %c0_3 = arith.constant 0 : index
    %2 = vector.load %arg2[%c1, %c0_2, %c0_3] : memref<3x128x12xbf16, #tpu.memory_space<vmem>>, vector<1x128x12xbf16>
    %3 = vector.shape_cast %2 : vector<1x128x12xbf16> to vector<128x12xbf16>
    %c2 = arith.constant 2 : index
    %c0_4 = arith.constant 0 : index
    %c0_5 = arith.constant 0 : index
    %4 = vector.load %arg2[%c2, %c0_4, %c0_5] : memref<3x128x12xbf16, #tpu.memory_space<vmem>>, vector<1x128x12xbf16>
    %5 = vector.shape_cast %4 : vector<1x128x12xbf16> to vector<128x12xbf16>
    %c0_6 = arith.constant 0 : index
    %c0_7 = arith.constant 0 : index
    %6 = vector.load %arg3[%c0_6, %c0_7] : memref<128x1xf32, #tpu.memory_space<vmem>>, vector<128x1xf32>
    %7 = vector.shape_cast %6 : vector<128x1xf32> to vector<128x1xf32>
    %8 = vector.broadcast %7 : vector<128x1xf32> to vector<128x128xf32>
    %cst = arith.constant 0.000000e+00 : f32
    %9 = vector.broadcast %cst : f32 to vector<128x1xf32>
    %c0_8 = arith.constant 0 : index
    %c0_9 = arith.constant 0 : index
    %c0_10 = arith.constant 0 : index
    %10 = vector.load %arg1[%c0_8, %c0_9, %c0_10] : memref<1x12x288xbf16, #tpu.memory_space<vmem>>, vector<1x12x128xbf16>
    %11 = vector.shape_cast %10 : vector<1x12x128xbf16> to vector<12x128xbf16>
    %cst_11 = arith.constant dense<0.000000e+00> : vector<128x128xf32>
    %12 = tpu.matmul %1, %11, %cst_11 {dimension_numbers = #tpu.dot_dimension_numbers<[1], [0], [0], [1], [0, 0, 1, 1], [], []>} : vector<128x12xbf16>, vector<12x128xbf16>, vector<128x128xf32> -> vector<128x128xf32>
    %13 = arith.addf %8, %12 : vector<128x128xf32>
    %c0_12 = arith.constant 0 : index
    %c0_13 = arith.constant 0 : index
    %c16 = arith.constant 16 : index
    %14 = vector.load %arg1[%c0_12, %c0_13, %c16] : memref<1x12x288xbf16, #tpu.memory_space<vmem>>, vector<1x12x128xbf16>
    %15 = vector.shape_cast %14 : vector<1x12x128xbf16> to vector<12x128xbf16>
    %cst_14 = arith.constant dense<0.000000e+00> : vector<128x128xf32>
    %16 = tpu.matmul %3, %15, %cst_14 {dimension_numbers = #tpu.dot_dimension_numbers<[1], [0], [0], [1], [0, 0, 1, 1], [], []>} : vector<128x12xbf16>, vector<12x128xbf16>, vector<128x128xf32> -> vector<128x128xf32>
    %17 = arith.addf %13, %16 : vector<128x128xf32>
    %c0_15 = arith.constant 0 : index
    %c0_16 = arith.constant 0 : index
    %c32 = arith.constant 32 : index
    %18 = vector.load %arg1[%c0_15, %c0_16, %c32] : memref<1x12x288xbf16, #tpu.memory_space<vmem>>, vector<1x12x128xbf16>
    %19 = vector.shape_cast %18 : vector<1x12x128xbf16> to vector<12x128xbf16>
    %cst_17 = arith.constant dense<0.000000e+00> : vector<128x128xf32>
    %20 = tpu.matmul %5, %19, %cst_17 {dimension_numbers = #tpu.dot_dimension_numbers<[1], [0], [0], [1], [0, 0, 1, 1], [], []>} : vector<128x12xbf16>, vector<12x128xbf16>, vector<128x128xf32> -> vector<128x128xf32>
    %21 = arith.addf %17, %20 : vector<128x128xf32>
    %cst_18 = arith.constant 0.000000e+00 : f32
    %22 = vector.broadcast %cst_18 : f32 to vector<128x128xf32>
    %23 = arith.maximumf %21, %22 : vector<128x128xf32>
    %cst_19 = arith.constant dense<0.000000e+00> : vector<128xf32>
    %24 = vector.multi_reduction <add>, %23, %cst_19 [1] : vector<128x128xf32> to vector<128xf32>
    %25 = vector.shape_cast %24 : vector<128xf32> to vector<128x1xf32>
    %26 = arith.addf %9, %25 : vector<128x1xf32>
    %c0_20 = arith.constant 0 : index
    %c0_21 = arith.constant 0 : index
    %c128 = arith.constant 128 : index
    %27 = vector.load %arg1[%c0_20, %c0_21, %c128] : memref<1x12x288xbf16, #tpu.memory_space<vmem>>, vector<1x12x128xbf16>
    %28 = vector.shape_cast %27 : vector<1x12x128xbf16> to vector<12x128xbf16>
    %cst_22 = arith.constant dense<0.000000e+00> : vector<128x128xf32>
    %29 = tpu.matmul %1, %28, %cst_22 {dimension_numbers = #tpu.dot_dimension_numbers<[1], [0], [0], [1], [0, 0, 1, 1], [], []>} : vector<128x12xbf16>, vector<12x128xbf16>, vector<128x128xf32> -> vector<128x128xf32>
    %30 = arith.addf %8, %29 : vector<128x128xf32>
    %c0_23 = arith.constant 0 : index
    %c0_24 = arith.constant 0 : index
    %c144 = arith.constant 144 : index
    %31 = vector.load %arg1[%c0_23, %c0_24, %c144] : memref<1x12x288xbf16, #tpu.memory_space<vmem>>, vector<1x12x128xbf16>
    %32 = vector.shape_cast %31 : vector<1x12x128xbf16> to vector<12x128xbf16>
    %cst_25 = arith.constant dense<0.000000e+00> : vector<128x128xf32>
    %33 = tpu.matmul %3, %32, %cst_25 {dimension_numbers = #tpu.dot_dimension_numbers<[1], [0], [0], [1], [0, 0, 1, 1], [], []>} : vector<128x12xbf16>, vector<12x128xbf16>, vector<128x128xf32> -> vector<128x128xf32>
    %34 = arith.addf %30, %33 : vector<128x128xf32>
    %c0_26 = arith.constant 0 : index
    %c0_27 = arith.constant 0 : index
    %c160 = arith.constant 160 : index
    %35 = vector.load %arg1[%c0_26, %c0_27, %c160] : memref<1x12x288xbf16, #tpu.memory_space<vmem>>, vector<1x12x128xbf16>
    %36 = vector.shape_cast %35 : vector<1x12x128xbf16> to vector<12x128xbf16>
    %cst_28 = arith.constant dense<0.000000e+00> : vector<128x128xf32>
    %37 = tpu.matmul %5, %36, %cst_28 {dimension_numbers = #tpu.dot_dimension_numbers<[1], [0], [0], [1], [0, 0, 1, 1], [], []>} : vector<128x12xbf16>, vector<12x128xbf16>, vector<128x128xf32> -> vector<128x128xf32>
    %38 = arith.addf %34, %37 : vector<128x128xf32>
    %cst_29 = arith.constant 0.000000e+00 : f32
    %39 = vector.broadcast %cst_29 : f32 to vector<128x128xf32>
    %40 = arith.maximumf %38, %39 : vector<128x128xf32>
    %cst_30 = arith.constant dense<0.000000e+00> : vector<128xf32>
    %41 = vector.multi_reduction <add>, %40, %cst_30 [1] : vector<128x128xf32> to vector<128xf32>
    %42 = vector.shape_cast %41 : vector<128xf32> to vector<128x1xf32>
    %43 = arith.addf %26, %42 : vector<128x1xf32>
    %cst_31 = arith.constant 3.906250e-03 : f32
    %44 = vector.broadcast %cst_31 : f32 to vector<128x1xf32>
    %45 = arith.mulf %43, %44 : vector<128x1xf32>
    %c0_32 = arith.constant 0 : index
    %c0_33 = arith.constant 0 : index
    %46 = vector.load %arg4[%c0_32, %c0_33] : memref<128x128xf32, #tpu.memory_space<vmem>>, vector<128x128xf32>
    %cst_34 = arith.constant dense<0.000000e+00> : vector<128x1xf32>
    %47 = tpu.matmul %46, %45, %cst_34 {dimension_numbers = #tpu.dot_dimension_numbers<[1], [0], [0], [1], [0, 0, 1, 1], [], []>} : vector<128x128xf32>, vector<128x1xf32>, vector<128x1xf32> -> vector<128x1xf32>
    %c0_35 = arith.constant 0 : index
    %c0_36 = arith.constant 0 : index
    %48 = vector.load %arg5[%c0_35, %c0_36] : memref<128x1xf32, #tpu.memory_space<vmem>>, vector<128x1xf32>
    %49 = arith.addf %47, %48 : vector<128x1xf32>
    %c0_37 = arith.constant 0 : index
    %c0_38 = arith.constant 0 : index
    %c0_39 = arith.constant 0 : index
    %50 = vector.load %arg6[%c0_37, %c0_38, %c0_39] : memref<1x128x1xf32, #tpu.memory_space<vmem>>, vector<1x128x1xf32>
    %51 = vector.shape_cast %50 : vector<1x128x1xf32> to vector<128x1xf32>
    %52 = vector.shape_cast %49 : vector<128x1xf32> to vector<1x128x1xf32>
    tpu.vector_store %arg6[%c0_37, %c0_38, %c0_39], %52 {strides = array<i32>} : memref<1x128x1xf32, #tpu.memory_space<vmem>>, vector<1x128x1xf32>,
    return
  }
  func.func @transform_0(%arg0: i32) -> (i32, i32, i32) {
    %c0_i32 = arith.constant 0 : i32
    %c0_i32_0 = arith.constant 0 : i32
    %c0_i32_1 = arith.constant 0 : i32
    return %arg0, %c0_i32, %c0_i32_0 : i32, i32, i32
  }
  func.func @transform_1(%arg0: i32) -> (i32, i32, i32) {
    %c0_i32 = arith.constant 0 : i32
    %c0_i32_0 = arith.constant 0 : i32
    %c0_i32_1 = arith.constant 0 : i32
    %c0_i32_2 = arith.constant 0 : i32
    return %c0_i32, %c0_i32_0, %c0_i32_1 : i32, i32, i32
  }
  func.func @transform_2(%arg0: i32) -> (i32, i32) {
    %c0_i32 = arith.constant 0 : i32
    %c0_i32_0 = arith.constant 0 : i32
    %c0_i32_1 = arith.constant 0 : i32
    return %c0_i32, %c0_i32_0 : i32, i32
  }
  func.func @transform_3(%arg0: i32) -> (i32, i32) {
    %c0_i32 = arith.constant 0 : i32
    %c0_i32_0 = arith.constant 0 : i32
    %c0_i32_1 = arith.constant 0 : i32
    return %c0_i32, %c0_i32_0 : i32, i32
  }
  func.func @transform_4(%arg0: i32) -> (i32, i32) {
    %c0_i32 = arith.constant 0 : i32
    %c0_i32_0 = arith.constant 0 : i32
    %c0_i32_1 = arith.constant 0 : i32
    return %c0_i32, %c0_i32_0 : i32, i32
  }
  func.func @transform_5(%arg0: i32) -> (i32, i32, i32) {
    %c0_i32 = arith.constant 0 : i32
    %c0_i32_0 = arith.constant 0 : i32
    %c0_i32_1 = arith.constant 0 : i32
    return %arg0, %c0_i32, %c0_i32_0 : i32, i32, i32
  }
}

</mosaic_0001>

<bundles_post_ra>
// kernel: ranzcr_resnet200d_forward.1
= control target key start
LH: loop header
LB: loop body
LE: loop exit
PB: predicated region body
PF: predicated region fallthrough
CT: control target
= control target key end

     0   :  { %s1643_s18 = smov 0   ;;  %s2181_s0 = inlined_call_operand.vmem [shape: bf16[2,12,288], index: 0, kind: input, shape index: {}]   ;;  %s2182_s1 = inlined_call_operand.vmem [shape: bf16[3,128,12], index: 1, kind: input, shape index: {}]   ;;  %s2183_s2 = inlined_call_operand.vmem [shape: f32[128,1], index: 2, kind: input, shape index: {}]   ;;  %s2184_s3 = inlined_call_operand.vmem [shape: f32[128,128], index: 3, kind: input, shape index: {}]   ;;  %s2185_s4 = inlined_call_operand.vmem [shape: f32[128,1], index: 4, kind: input, shape index: {}]   ;;  %s2186_s5 = inlined_call_operand.vmem [shape: f32[2,128,1], index: 5, kind: output, shape index: {}]  }
   0x1 LB: > { %s1343_s19 = sadd.s32 4294967295, %s1608_s18   ;;  %p1347_p0 = scmp.ge.s32.totalorder %s1608_s18, 1  ;;  %s1608_s18 = sphi %s1643_s18, %s15_s18  }
   0x2   : > { %p187_p1 = scmp.lt.s32.totalorder %s1608_s18, 3 }
   0x4   : > { %p188_p2 = pnand %p1347_p0, %p187_p1 }
   0x5   : > { %p215_p3 = scmp.lt.s32.totalorder (!%p188_p2), %s1343_s19, 1  ;;  %s1611_s24 = smov (!%p188_p2), 96  }
   0x6   : > { %191 = sbr.rel (%p188_p2) target bundleno = 903 (0x387), region = 40  ;;  %s1612_s25 = smov (!%p188_p2), 112  }
   0xb   : > { %v1610_v0 = vmov 0   ;;  %s2188_s19 = smov (!%p215_p3, %s1343_s19), 1  ;;  %vm444_vm0 = vcmask 1045504   ;;  %v1670_v12 = vld [vmem:[%s2182_s1 + $0x30] sm:$0xff]  ;;  %v1678_v16 = vld [vmem:[%s2182_s1] sm:$0xff]  ;;  %vm419_vm1 = vcmask 97280  }
   0xc   : > { %1600 = vset.pattern.permute.xlu0 %v1610_v0  ;;  %1601 = vset.pattern.permute.xlu1 %v1610_v0  ;;  %s1587_s20 = smul.u32 24, %s2188_s19  ;;  %v1687_v19 = vld [vmem:[%s2182_s1 + $0x38] sm:$0xff]  ;;  %v290_v20 = vld [vmem:[%s2183_s2 + $0x70] sm:$0xff]  ;;  %v285_v21 = vld [vmem:[%s2183_s2 + $0x48] sm:$0xff]  ;;  %vm567_vm2 = vcmask 916480   ;;  %vm705_vm3 = vcmask 785408  }
   0xd   : > { %1599 = vset.pattern.permute.xlu2 %v1610_v0  ;;  %v1700_v22 = vld [vmem:[%s2182_s1 + $0x8] sm:$0xff]  ;;  %v291_v23 = vld [vmem:[%s2183_s2 + $0x78] sm:$0xff]  ;;  %v282_v25 = vld [vmem:[%s2183_s2 + $0x30] sm:$0xff]  ;;  %vm1271_vm4 = vcmask 7168  }
   0xe   : > { %s1657_s23 = scalar_lea.vmem %s2181_s0, %s1587_s20  ;;  %v289_v24 = vld [vmem:[%s2183_s2 + $0x68] sm:$0xff]  ;;  %v288_v26 = vld [vmem:[%s2183_s2 + $0x60] sm:$0xff]  ;;  %v287_v27 = vld [vmem:[%s2183_s2 + $0x58] sm:$0xff] }
   0xf   : > { %v1461_v1 = vld [vmem:[%s1657_s23] sm:$0xf]  ;;  %v1580_v2 = vld [vmem:[%s1657_s23 + $0x8] sm:$0x30]  ;;  %v1529_v4 = vld [vmem:[%s1657_s23 + $0x4] sm:$0xf] }
  0x10   : > { %v1462_v3 = vor.u32 %v1580_v2, %v1461_v1  ;;  %v1583_v5 = vld [vmem:[%s1657_s23 + $0xc] sm:$0x30]  ;;  %v1417_v6 = vld [vmem:[%s1657_s23] sm:$0xf]  ;;  %v1578_v8 = vld [vmem:[%s1657_s23 + $0x8] sm:$0x30] }
  0x11   : > { %v1530_v7 = vor.u32 %v1583_v5, %v1529_v4  ;;  %v1579_v9 = vld [vmem:[%s1657_s23 + $0x4] sm:$0xf]  ;;  %v1463_v10 = vld [vmem:[%s1657_s23 + $0xc] sm:$0x30]  ;;  %v1418_v11 = vor.u32 %v1578_v8, %v1417_v6  ;;  %v1582_v13 = vld [vmem:[%s1657_s23 + $0x8] sm:$0xf] }
  0x12   : > { %701 = vrot.lane.b32.xlu1 %v1462_v3, %s1611_s24  ;;  %563 = vrot.lane.b32.xlu0 %v1462_v3, %s1612_s25  ;;  %v1531_v14 = vld [vmem:[%s1657_s23 + $0x10] sm:$0x30]  ;;  %v1466_v17 = vor.u32 %v1579_v9, %v1463_v10  ;;  %v279_v28 = vld [vmem:[%s2183_s2 + $0x18] sm:$0xff] }
  0x13   : > { %948 = vrot.lane.b32.xlu2 %v1530_v7, %s1612_s25  ;;  %v446_v15 = vsel %vm444_vm0, %v1418_v11, 0  ;;  %v1534_v18 = vor.u32 %v1582_v13, %v1531_v14  ;;  %v1725_v29 = vld [vmem:[%s2182_s1 + $0x10] sm:$0xff]  ;;  %v284_v31 = vld [vmem:[%s2183_s2 + $0x40] sm:$0xff]  ;;  %v283_v33 = vld [vmem:[%s2183_s2 + $0x38] sm:$0xff] }
  0x14   : > { %1584 = vmatpush.bf16.msra.mxu3 %v446_v15  ;;  %455 = vmatpush.bf16.msra.mxu0 %v446_v15  ;;  %v286_v30 = vld [vmem:[%s2183_s2 + $0x50] sm:$0xff]  ;;  %v276_v32 = vld [vmem:[%s2183_s2] sm:$0xff]  ;;  %v281_v34 = vld [vmem:[%s2183_s2 + $0x28] sm:$0xff] }
  0x15   : > { %v1747_v35 = vld [vmem:[%s2182_s1 + $0x18] sm:$0xff]  ;;  %v280_v38 = vld [vmem:[%s2183_s2 + $0x20] sm:$0xff]  ;;  %v278_v39 = vld [vmem:[%s2183_s2 + $0x10] sm:$0xff] }
  0x16   : > { %v1562_v46 = vld [vmem:[%s2182_s1 + $0x40] sm:$0xff]  ;;  %v1767_v47 = vld [vmem:[%s2182_s1 + $0x70] sm:$0xff]  ;;  %v277_v49 = vld [vmem:[%s2183_s2 + $0x8] sm:$0xff] }
  0x17   : > { %1425 = vmatmul.msk.bf16.vlgmr.msra.gmra.mxu3 %vm419_vm1, %v1670_v12  ;;  %1419 = vmatmul.msk.bf16.vlgmr.msra.gmra.mxu0 %vm419_vm1, %v1678_v16  ;;  %v1772_v48 = vld [vmem:[%s2182_s1 + $0x80] sm:$0xff]  ;;  %v1563_v52 = vld [vmem:[%s2182_s1 + $0x48] sm:$0xff]  ;;  %v1795_v53 = vld [vmem:[%s2182_s1 + $0x78] sm:$0xff] }
  0x18   : > { %v1785_v50 = vld [vmem:[%s2182_s1 + $0x20] sm:$0xff]  ;;  %v1800_v54 = vld [vmem:[%s2182_s1 + $0x88] sm:$0xff]  ;;  %v1581_v61 = vld [vmem:[%s1657_s23 + $0xc] sm:$0x30] }
  0x19   : > { %v1811_v57 = vld [vmem:[%s2182_s1 + $0x28] sm:$0xff]  ;;  %v1517_v60 = vld [vmem:[%s1657_s23 + $0x4] sm:$0xf]  ;;  %v1564_v3 = vld [vmem:[%s2182_s1 + $0x50] sm:$0xff] }
  0x1a   : > { %703 = vrot.lane.b32.xlu1 %v1466_v17, %s1611_s24  ;;  %565 = vrot.lane.b32.xlu0 %v1466_v17, %s1612_s25  ;;  %v1518_v63 = vor.u32 %v1581_v61, %v1517_v60  ;;  %v1827_v4 = vld [vmem:[%s2182_s1 + $0xb0] sm:$0xff]  ;;  %v1565_v6 = vld [vmem:[%s2182_s1 + $0x58] sm:$0xff] }
  0x1b   : > { %950 = vrot.lane.b32.xlu2 %v1534_v18, %s1612_s25  ;;  %v1572_v5 = vld [vmem:[%s2182_s1 + $0x90] sm:$0xff]  ;;  %v1848_v8 = vld [vmem:[%s2182_s1 + $0x98] sm:$0xff]  ;;  %v1566_v9 = vld [vmem:[%s2182_s1 + $0x60] sm:$0xff]  ;;  %s1553_s25 = sshll.u32 %s2188_s19, 7 }
  0x1c   : > { %v871_v2 = vsel %vm444_vm0, %v1518_v63, 0  ;;  %v1862_v10 = vld [vmem:[%s2182_s1 + $0xa0] sm:$0xff]  ;;  %v1567_v13 = vld [vmem:[%s2182_s1 + $0x68] sm:$0xff]  ;;  %s2099_s30 = scalar_lea.vmem %s2186_s5, %s1553_s25 }
  0x1d   : > { %v1876_v14 = vld [vmem:[%s2182_s1 + $0xa8] sm:$0xff] }
  0x22   : > { %1023 = vrot.lane.b32.xlu1 %v1534_v18, %s1611_s24  ;;  %1021 = vrot.lane.b32.xlu0 %v1530_v7, %s1611_s24  ;;  %v1843_v7 = vld [vmem:[%s2182_s1 + $0xb8] sm:$0xff] }
  0x23   : > { %369 = vperm.xlu2 %1599, %v291_v23  }
  0x27   : > { %1426 = vmatmul.msk.bf16.gmra.mxu3 %vm419_vm1, %v1687_v19  ;;  %1420 = vmatmul.msk.bf16.gmra.mxu0 %vm419_vm1, %v1700_v22 }
  0x2a   : > { %364 = vperm.xlu0 %1600, %v290_v20   ;;  %359 = vperm.xlu1 %1601, %v289_v24  }
  0x2b   : > { %354 = vperm.xlu2 %1599, %v288_v26  }
  0x32   : > { %339 = vperm.xlu0 %1600, %v285_v21   ;;  %349 = vperm.xlu1 %1601, %v287_v27  }
  0x33   : > { %344 = vperm.xlu2 %1599, %v286_v30  }
  0x37   : > { %1421 = vmatmul.msk.bf16.gmra.mxu0 %vm419_vm1, %v1725_v29 }
  0x3a   : > { %324 = vperm.xlu0 %1600, %v282_v25   ;;  %334 = vperm.xlu1 %1601, %v284_v31  }
  0x3b   : > { %329 = vperm.xlu2 %1599, %v283_v33  }
  0x42   : > { %309 = vperm.xlu0 %1600, %v279_v28   ;;  %319 = vperm.xlu1 %1601, %v281_v34  }
  0x43   : > { %314 = vperm.xlu2 %1599, %v280_v38  }
  0x47   : > { %1422 = vmatmul.msk.bf16.gmra.mxu0 %vm419_vm1, %v1747_v35 }
  0x4a   : > { %294 = vperm.xlu0 %1600, %v276_v32   ;;  %304 = vperm.xlu1 %1601, %v278_v39  }
  0x4b   : > { %299 = vperm.xlu2 %1599, %v277_v49  }
  0x57   : > { %1423 = vmatmul.msk.bf16.gmra.mxu0 %vm419_vm1, %v1785_v50 }
  0x67   : > { %1424 = vmatmul.msk.bf16.gmra.mxu0 %vm419_vm1, %v1811_v57 }
  0x6d   : > { %v949_v51 = vpop.permute.xlu2 %948 }
  0x75   : > { %v951_v55 = vpop.permute.xlu2 %950 }
  0x76   : > { %v952_v56 = vsel %vm567_vm2, %v949_v51, %v951_v55 }
  0x77   : > { %v954_v62 = vsel %vm444_vm0, %v952_v56, 0 }
  0x78   : > { %963 = vmatpush.bf16.msrb.mxu0 %v954_v62 }
  0x7b   : > { %1535 = vmatmul.msk.bf16.vlgmr.msrb.gmra.mxu0 %vm419_vm1, %v1562_v46 }
  0x7d   : > { %v1878_v17 = vpop.permute.xlu2 %369 }
  0x84   : > { %v702_v36 = vpop.permute.xlu1 %701  ;;  %v564_v37 = vpop.permute.xlu0 %563 }
  0x85   : > { %v1888_v20 = vpop.permute.xlu2 %354 }
  0x8b   : > { %1536 = vmatmul.msk.bf16.gmra.mxu0 %vm419_vm1, %v1563_v52 }
  0x8c   : > { %v704_v40 = vpop.permute.xlu1 %703  ;;  %v566_v41 = vpop.permute.xlu0 %565 }
  0x8d   : > { %v568_v42 = vsel %vm567_vm2, %v564_v37, %v566_v41  ;;  %v706_v43 = vsel %vm705_vm3, %v702_v36, %v704_v40  ;;  %v1898_v25 = vpop.permute.xlu2 %344 }
  0x8e   : > { %v594_v44 = vsel %vm444_vm0, %v568_v42, 0  ;;  %v732_v45 = vsel %vm444_vm0, %v706_v43, 0 }
  0x8f   : > { %603 = vmatpush.bf16.msra.mxu1 %v594_v44  ;;  %1585 = vmatpush.bf16.msrb.mxu3 %v594_v44 }
  0x90   : > { %741 = vmatpush.bf16.msra.mxu2 %v732_v45 }
  0x92   : > { %1467 = vmatmul.msk.bf16.vlgmr.msra.gmra.mxu1 %vm419_vm1, %v1562_v46  ;;  %1473 = vmatmul.msk.bf16.vlgmr.msrb.gmra.mxu3 %vm419_vm1, %v1767_v47 }
  0x93   : > { %1586 = vmatpush.bf16.msra.mxu3 %v732_v45  ;;  %1507 = vmatmul.msk.bf16.vlgmr.msra.gmra.mxu2 %vm419_vm1, %v1772_v48 }
  0x94   : > { %v1024_v58 = vpop.permute.xlu1 %1023  ;;  %v1022_v59 = vpop.permute.xlu0 %1021 }
  0x95   : > { %v1025_v0 = vsel %vm705_vm3, %v1022_v59, %v1024_v58  ;;  %v457_v11 = vpop.f32.mrf.mxu0  ;;  %v1907_v31 = vpop.permute.xlu2 %329 }
  0x96   : > { %v1027_v1 = vsel %vm444_vm0, %v1025_v0, 0 }
  0x97   : > { %1036 = vmatpush.bf16.msrb.mxu1 %v1027_v1  ;;  %880 = vmatpush.bf16.msrb.mxu3 %v871_v2 }
  0x9a   : > { %v487_v23 = vpop.f32.mrf.mxu3 }
  0x9b   : > { %1537 = vmatmul.msk.bf16.gmra.mxu0 %vm419_vm1, %v1564_v3 }
  0x9c   : > { %v1880_v18 = vpop.permute.xlu0 %364  ;;  %v1892_v24 = vpop.permute.xlu1 %359 }
  0x9d   : > { %v459_v15 = vpop.f32.mrf.mxu0  ;;  %v1920_v36 = vpop.permute.xlu2 %314 }
  0xa2   : > { %1468 = vmatmul.msk.bf16.gmra.mxu1 %vm419_vm1, %v1563_v52  ;;  %1474 = vmatmul.msk.bf16.gmra.mxu3 %vm419_vm1, %v1795_v53  ;;  %v1903_v27 = vpop.f32.mrf.mxu3 }
  0xa3   : > { %1508 = vmatmul.msk.bf16.gmra.mxu2 %vm419_vm1, %v1800_v54 }
  0xa4   : > { %v1890_v21 = vpop.permute.xlu0 %339  ;;  %v1905_v28 = vpop.permute.xlu1 %349 }
  0xa5   : > { %v1936_v43 = vpop.permute.xlu2 %299 }
  0xa6   : > { %v498_v45 = vadd.f32 %v459_v15, %v1936_v43 }
  0xab   : > { %1538 = vmatmul.msk.bf16.gmra.mxu0 %vm419_vm1, %v1565_v6 }
  0xac   : > { %v1900_v26 = vpop.permute.xlu0 %324  ;;  %v1917_v33 = vpop.permute.xlu1 %334 }
  0xb2   : > { %1469 = vmatmul.msk.bf16.gmra.mxu1 %vm419_vm1, %v1564_v3  ;;  %1513 = vmatmul.msk.bf16.vlgmr.msra.gmra.mxu3 %vm419_vm1, %v1827_v4 }
  0xb3   : > { %1509 = vmatmul.msk.bf16.gmra.mxu2 %vm419_vm1, %v1572_v5 }
  0xb4   : > { %v1909_v32 = vpop.permute.xlu0 %309  ;;  %v1927_v41 = vpop.permute.xlu1 %319 }
  0xbb   : > { %1539 = vmatmul.msk.bf16.gmra.mxu0 %vm419_vm1, %v1566_v9 }
  0xbc   : > { %v1922_v37 = vpop.permute.xlu0 %294  ;;  %v1945_v51 = vpop.permute.xlu1 %304 }
  0xbd   : > { %v497_v39 = vadd.f32 %v457_v11, %v1922_v37 }
  0xc2   : > { %1470 = vmatmul.msk.bf16.gmra.mxu1 %vm419_vm1, %v1565_v6  ;;  %1514 = vmatmul.msk.bf16.gmra.mxu3 %vm419_vm1, %v1843_v7  ;;  %v509_v6 = vadd.f32 %v487_v23, %v1888_v20  ;;  %v510_v23 = vadd.f32 %v1903_v27, %v1892_v24 }
  0xc3   : > { %1510 = vmatmul.msk.bf16.gmra.mxu2 %vm419_vm1, %v1848_v8 }
  0xcb   : > { %1540 = vmatmul.msk.bf16.gmra.mxu0 %vm419_vm1, %v1567_v13 }
  0xd2   : > { %1471 = vmatmul.msk.bf16.gmra.mxu1 %vm419_vm1, %v1566_v9  ;;  %1519 = vmatmul.msk.bf16.vlgmr.msrb.gmra.mxu3 %vm419_vm1, %v1678_v16  ;;  %v462_v16 = vpop.f32.mrf.mxu0 }
  0xd3   : > { %1511 = vmatmul.msk.bf16.gmra.mxu2 %vm419_vm1, %v1862_v10 }
  0xdb   : > { %1541 = vmatmul.msk.bf16.gmra.mxu0 %vm419_vm1, %v1767_v47 }
  0xe2   : > { %1472 = vmatmul.msk.bf16.gmra.mxu1 %vm419_vm1, %v1567_v13  ;;  %1520 = vmatmul.msk.bf16.gmra.mxu3 %vm419_vm1, %v1700_v22  ;;  %v464_v22 = vpop.f32.mrf.mxu0 }
  0xe3   : > { %1512 = vmatmul.msk.bf16.gmra.mxu2 %vm419_vm1, %v1876_v14  ;;  %v500_v60 = vadd.f32 %v464_v22, %v1909_v32 }
  0xea   : > { %v467_v30 = vpop.f32.mrf.mxu0 }
  0xeb   : > { %1542 = vmatmul.msk.bf16.gmra.mxu0 %vm419_vm1, %v1795_v53  ;;  %v501_v0 = vadd.f32 %v467_v30, %v1920_v36 }
  0xf2   : > { %1521 = vmatmul.msk.bf16.gmra.mxu3 %vm419_vm1, %v1725_v29  ;;  %1543 = vmatmul.msk.bf16.vlgmr.msrb.gmra.mxu1 %vm419_vm1, %v1772_v48  ;;  %v1911_v29 = vpop.f32.mrf.mxu3  ;;  %v469_v34 = vpop.f32.mrf.mxu0 }
  0xf3   : > { %v502_v9 = vadd.f32 %v469_v34, %v1927_v41 }
  0xfa   : > { %v1924_v38 = vpop.f32.mrf.mxu3  ;;  %v1931_v42 = vpop.f32.mrf.mxu0 }
 0x102   : > { %1522 = vmatmul.msk.bf16.gmra.mxu3 %vm419_vm1, %v1747_v35  ;;  %1544 = vmatmul.msk.bf16.gmra.mxu1 %vm419_vm1, %v1800_v54  ;;  %v1947_v52 = vpop.f32.mrf.mxu0 }
 0x10a   : > { %v477_v59 = vpop.f32.mrf.mxu0 }
 0x10f   : > { %v605_v40 = vpop.f32.mrf.mxu1 }
 0x110   : > { %v1929_v35 = vadd.f32 %v605_v40, %v497_v39 }
 0x112   : > { %1523 = vmatmul.msk.bf16.gmra.mxu3 %vm419_vm1, %v1785_v50  ;;  %1545 = vmatmul.msk.bf16.gmra.mxu1 %vm419_vm1, %v1572_v5  ;;  %v499_v50 = vadd.f32 %v462_v16, %v1945_v51  ;;  %v1968_v3 = vpop.f32.mrf.mxu0 }
 0x115   : > { %v635_v44 = vpop.f32.mrf.mxu3 }
 0x116   : > { %v1939_v46 = vpop.f32.mrf.mxu2  ;;  %v657_v53 = vadd.f32 %v635_v44, %v509_v6 }
 0x117   : > { %v607_v48 = vpop.f32.mrf.mxu1 }
 0x118   : > { %v1943_v49 = vadd.f32 %v607_v48, %v498_v45 }
 0x11a   : > { %v482_v39 = vpop.f32.mrf.mxu0 }
 0x11d   : > { %v637_v54 = vpop.f32.mrf.mxu3 }
 0x11e   : > { %v1950_v55 = vpop.f32.mrf.mxu2 }
 0x11f   : > { %v610_v56 = vpop.f32.mrf.mxu1 }
 0x120   : > { %v1952_v58 = vadd.f32 %v610_v56, %v499_v50  ;;  %v511_v50 = vadd.f32 %v1911_v29, %v1880_v18  ;;  %v512_v29 = vadd.f32 %v1924_v38, %v1878_v17 }
 0x122   : > { %1524 = vmatmul.msk.bf16.gmra.mxu3 %vm419_vm1, %v1811_v57  ;;  %1546 = vmatmul.msk.bf16.gmra.mxu1 %vm419_vm1, %v1848_v8  ;;  %v484_v27 = vpop.f32.mrf.mxu0 }
 0x125   : > { %v640_v47 = vpop.f32.mrf.mxu3 }
 0x126   : > { %v1959_v61 = vpop.f32.mrf.mxu2  ;;  %v659_v56 = vadd.f32 %v640_v47, %v511_v50 }
 0x127   : > { %v612_v62 = vpop.f32.mrf.mxu1 }
 0x128   : > { %v1963_v63 = vadd.f32 %v612_v62, %v500_v60 }
 0x12d   : > { %v642_v1 = vpop.f32.mrf.mxu3 }
 0x12e   : > { %v1966_v2 = vpop.f32.mrf.mxu2 }
 0x12f   : > { %v615_v57 = vpop.f32.mrf.mxu1 }
 0x130   : > { %v649_v5 = vadd.f32 %v615_v57, %v501_v0  ;;  %v503_v0 = vadd.f32 %v1931_v42, %v1900_v26  ;;  %v505_v42 = vadd.f32 %v477_v59, %v1917_v33  ;;  %v506_v59 = vadd.f32 %v1968_v3, %v1890_v21 }
 0x132   : > { %1525 = vmatmul.msk.bf16.gmra.mxu3 %vm419_vm1, %v1670_v12  ;;  %1547 = vmatmul.msk.bf16.gmra.mxu1 %vm419_vm1, %v1862_v10  ;;  %v658_v12 = vadd.f32 %v637_v54, %v510_v23 }
 0x135   : > { %v773_v8 = vpop.f32.mrf.mxu3 }
 0x136   : > { %v753_v11 = vpop.f32.mrf.mxu2  ;;  %v795_v13 = vadd.f32 %v773_v8, %v657_v53 }
 0x137   : > { %v1976_v15 = vadd.f32 %v753_v11, %v649_v5  ;;  %v617_v16 = vpop.f32.mrf.mxu1 }
 0x138   : > { %v811_v22 = vmax.f32 %v795_v13, 0.0  ;;  %v650_v30 = vadd.f32 %v617_v16, %v502_v9  ;;  %v504_v13 = vadd.f32 %v1947_v52, %v1907_v31 }
 0x13a   : > { %839 = vadd.xlane.f32.xlu0 %v811_v22 }
 0x13d   : > { %v775_v40 = vpop.f32.mrf.mxu3 }
 0x13e   : > { %v755_v45 = vpop.f32.mrf.mxu2  ;;  %v796_v10 = vadd.f32 %v775_v40, %v658_v12 }
 0x13f   : > { %v1980_v44 = vadd.f32 %v755_v45, %v650_v30  ;;  %v620_v48 = vpop.f32.mrf.mxu1 }
 0x140   : > { %v812_v34 = vmax.f32 %v796_v10, 0.0  ;;  %v651_v6 = vadd.f32 %v620_v48, %v503_v0 }
 0x142   : > { %1526 = vmatmul.msk.bf16.gmra.mxu3 %vm419_vm1, %v1687_v19  ;;  %1548 = vmatmul.msk.bf16.gmra.mxu1 %vm419_vm1, %v1876_v14  ;;  %v660_v19 = vadd.f32 %v642_v1, %v512_v29  ;;  %v965_v14 = vpop.f32.mrf.mxu0 }
 0x143   : > { %841 = vadd.xlane.f32.xlu1 %v812_v34 }
 0x145   : > { %v778_v54 = vpop.f32.mrf.mxu3 }
 0x146   : > { %v758_v60 = vpop.f32.mrf.mxu2  ;;  %v797_v62 = vadd.f32 %v778_v54, %v659_v56 }
 0x147   : > { %v622_v57 = vpop.f32.mrf.mxu1  ;;  %v789_v53 = vadd.f32 %v758_v60, %v651_v6 }
 0x148   : > { %v813_v5 = vmax.f32 %v797_v62, 0.0  ;;  %v652_v30 = vadd.f32 %v622_v57, %v504_v13 }
 0x149   : > { %v805_v22 = vmax.f32 %v789_v53, 0.0 }
 0x14a   : > { %843 = vadd.xlane.f32.xlu0 %v813_v5  ;;  %v967_v48 = vpop.f32.mrf.mxu0 }
 0x14d   : > { %v780_v8 = vpop.f32.mrf.mxu3 }
 0x14e   : > { %v760_v9 = vpop.f32.mrf.mxu2  ;;  %v798_v11 = vadd.f32 %v780_v8, %v660_v19 }
 0x14f   : > { %v625_v47 = vpop.f32.mrf.mxu1  ;;  %v790_v38 = vadd.f32 %v760_v9, %v652_v30 }
 0x150   : > { %v814_v16 = vmax.f32 %v798_v11, 0.0  ;;  %v653_v1 = vadd.f32 %v625_v47, %v505_v42  ;;  %v508_v11 = vadd.f32 %v484_v27, %v1905_v28 }
 0x151   : > { %v806_v52 = vmax.f32 %v790_v38, 0.0 }
 0x152   : > { %1549 = vmatmul.msk.bf16.gmra.mxu1 %vm419_vm1, %v1827_v4  ;;  %845 = vadd.xlane.f32.xlu1 %v814_v16  ;;  %v970_v29 = vpop.f32.mrf.mxu0 }
 0x153   : > { %827 = vadd.xlane.f32.xlu0 %v805_v22 }
 0x155   : > { %v882_v23 = vpop.f32.mrf.mxu3 }
 0x156   : > { %v763_v12 = vpop.f32.mrf.mxu2  ;;  %v922_v40 = vadd.f32 %v882_v23, %v1922_v37  ;;  %v507_v37 = vadd.f32 %v482_v39, %v1898_v25 }
 0x157   : > { %v791_v45 = vadd.f32 %v763_v12, %v653_v1  ;;  %v627_v10 = vpop.f32.mrf.mxu1 }
 0x158   : > { %v1005_v34 = vadd.f32 %v965_v14, %v922_v40  ;;  %v654_v4 = vadd.f32 %v627_v10, %v506_v59 }
 0x159   : > { %v807_v50 = vmax.f32 %v791_v45, 0.0 }
 0x15a   : > { %829 = vadd.xlane.f32.xlu1 %v806_v52  ;;  %v972_v47 = vpop.f32.mrf.mxu0 }
 0x15b   : > { %831 = vadd.xlane.f32.xlu2 %v807_v50 }
 0x15d   : > { %v884_v56 = vpop.f32.mrf.mxu3 }
 0x15e   : > { %v765_v54 = vpop.f32.mrf.mxu2  ;;  %v923_v60 = vadd.f32 %v884_v56, %v1936_v43 }
 0x15f   : > { %v792_v62 = vadd.f32 %v765_v54, %v654_v4  ;;  %v630_v0 = vpop.f32.mrf.mxu1 }
 0x160   : > { %v1006_v57 = vadd.f32 %v967_v48, %v923_v60  ;;  %v655_v6 = vadd.f32 %v630_v0, %v507_v37 }
 0x161   : > { %v808_v5 = vmax.f32 %v792_v62, 0.0 }
 0x162   : > { %1550 = vmatmul.msk.bf16.gmra.mxu1 %vm419_vm1, %v1843_v7  ;;  %v975_v23 = vpop.f32.mrf.mxu0 }
 0x163   : > { %833 = vadd.xlane.f32.xlu0 %v808_v5 }
 0x165   : > { %v887_v19 = vpop.f32.mrf.mxu3 }
 0x166   : > { %v768_v3 = vpop.f32.mrf.mxu2  ;;  %v924_v53 = vadd.f32 %v887_v19, %v1945_v51 }
 0x167   : > { %v793_v8 = vadd.f32 %v768_v3, %v655_v6  ;;  %v632_v14 = vpop.f32.mrf.mxu1 }
 0x168   : > { %v1007_v9 = vadd.f32 %v970_v29, %v924_v53  ;;  %v656_v39 = vadd.f32 %v632_v14, %v508_v11 }
 0x169   : > { %v809_v43 = vmax.f32 %v793_v8, 0.0 }
 0x16a   : > { %v977_v48 = vpop.f32.mrf.mxu0 }
 0x16b   : > { %835 = vadd.xlane.f32.xlu1 %v809_v43 }
 0x16d   : > { %v889_v13 = vpop.f32.mrf.mxu3 }
 0x16e   : > { %v770_v16 = vpop.f32.mrf.mxu2  ;;  %v925_v42 = vadd.f32 %v889_v13, %v1909_v32 }
 0x16f   : > { %v794_v7 = vadd.f32 %v770_v16, %v656_v39  ;;  %v1038_v22 = vpop.f32.mrf.mxu1 }
 0x170   : > { %v1008_v30 = vadd.f32 %v972_v47, %v925_v42  ;;  %v2007_v38 = vadd.f32 %v1038_v22, %v1005_v34 }
 0x171   : > { %v810_v1 = vmax.f32 %v794_v7, 0.0 }
 0x172   : > { %v980_v34 = vpop.f32.mrf.mxu0 }
 0x173   : > { %837 = vadd.xlane.f32.xlu2 %v810_v1 }
 0x175   : > { %v892_v51 = vpop.f32.mrf.mxu3 }
 0x176   : > { %v926_v12 = vadd.f32 %v892_v51, %v1920_v36 }
 0x177   : > { %v1040_v40 = vpop.f32.mrf.mxu1 }
 0x178   : > { %v1009_v27 = vadd.f32 %v975_v23, %v926_v12  ;;  %v2010_v45 = vadd.f32 %v1040_v40, %v1006_v57 }
 0x17a   : > { %v982_v62 = vpop.f32.mrf.mxu0 }
 0x17d   : > { %v894_v10 = vpop.f32.mrf.mxu3 }
 0x17f   : > { %v1043_v52 = vpop.f32.mrf.mxu1 }
 0x180   : > { %v2012_v50 = vadd.f32 %v1043_v52, %v1007_v9 }
 0x182   : > { %v985_v5 = vpop.f32.mrf.mxu0 }
 0x185   : > { %v897_v32 = vpop.f32.mrf.mxu3 }
 0x186   : > { %v928_v0 = vadd.f32 %v897_v32, %v1900_v26 }
 0x187   : > { %v1045_v59 = vpop.f32.mrf.mxu1 }
 0x188   : > { %v2014_v4 = vadd.f32 %v1045_v59, %v1008_v30  ;;  %v1011_v37 = vadd.f32 %v980_v34, %v928_v0 }
 0x18a   : > { %v987_v14 = vpop.f32.mrf.mxu0 }
 0x18d   : > { %v899_v56 = vpop.f32.mrf.mxu3 }
 0x18e   : > { %v929_v19 = vadd.f32 %v899_v56, %v1907_v31 }
 0x18f   : > { %v1048_v54 = vpop.f32.mrf.mxu1 }
 0x190   : > { %v2016_v60 = vadd.f32 %v1048_v54, %v1009_v27  ;;  %v1012_v8 = vadd.f32 %v982_v62, %v929_v19  ;;  %v927_v62 = vadd.f32 %v894_v10, %v1927_v41  ;;  %v786_v41 = vadd.f32 %v1966_v2, %v1963_v63 }
 0x191   : > { %v1097_v63 = vmax.f32 %v2014_v4, 0.0  ;;  %v804_v4 = vmax.f32 %v1980_v44, 0.0 }
 0x192   : > { %v990_v42 = vpop.f32.mrf.mxu0 }
 0x195   : > { %v902_v57 = vpop.f32.mrf.mxu3 }
 0x196   : > { %v930_v11 = vadd.f32 %v902_v57, %v1917_v33 }
 0x197   : > { %v1050_v36 = vpop.f32.mrf.mxu1 }
 0x198   : > { %v1013_v26 = vadd.f32 %v985_v5, %v930_v11  ;;  %v1010_v5 = vadd.f32 %v977_v48, %v927_v62 }
 0x19a   : > { %v992_v40 = vpop.f32.mrf.mxu0 }
 0x19d   : > { %v904_v53 = vpop.f32.mrf.mxu3 }
 0x19e   : > { %v931_v7 = vadd.f32 %v904_v53, %v1890_v21 }
 0x19f   : > { %v1053_v29 = vpop.f32.mrf.mxu1 }
 0x1a0   : > { %v1084_v6 = vadd.f32 %v1053_v29, %v1011_v37  ;;  %v1014_v31 = vadd.f32 %v987_v14, %v931_v7  ;;  %v1083_v29 = vadd.f32 %v1050_v36, %v1010_v5  ;;  %v803_v36 = vmax.f32 %v1976_v15, 0.0 }
 0x1a1   : > { %v784_v15 = vadd.f32 %v1950_v55, %v1943_v49  ;;  %v1095_v55 = vmax.f32 %v2010_v45, 0.0 }
 0x1a2   : > { %v1100_v3 = vmax.f32 %v1084_v6, 0.0  ;;  %v995_v21 = vpop.f32.mrf.mxu0 }
 0x1a4   : > { %1122 = vadd.xlane.f32.xlu1 %v1100_v3 }
 0x1a5   : > { %v907_v39 = vpop.f32.mrf.mxu3 }
 0x1a6   : > { %v932_v23 = vadd.f32 %v907_v39, %v1898_v25  ;;  %v802_v39 = vmax.f32 %v786_v41, 0.0 }
 0x1a7   : > { %v1055_v9 = vpop.f32.mrf.mxu1 }
 0x1a8   : > { %v1085_v43 = vadd.f32 %v1055_v9, %v1012_v8  ;;  %v1015_v33 = vadd.f32 %v990_v42, %v932_v23  ;;  %v1096_v42 = vmax.f32 %v2012_v50, 0.0  ;;  %v800_v23 = vmax.f32 %v784_v15, 0.0 }
 0x1aa   : > { %v1101_v47 = vmax.f32 %v1085_v43, 0.0  ;;  %v997_v19 = vpop.f32.mrf.mxu0 }
 0x1ac   : > { %1124 = vadd.xlane.f32.xlu2 %v1101_v47 }
 0x1ad   : > { %v909_v30 = vpop.f32.mrf.mxu3 }
 0x1ae   : > { %v933_v59 = vadd.f32 %v909_v30, %v1905_v28  ;;  %v1099_v28 = vmax.f32 %v1083_v29, 0.0 }
 0x1af   : > { %v1058_v13 = vpop.f32.mrf.mxu1 }
 0x1b0   : > { %v1086_v16 = vadd.f32 %v1058_v13, %v1013_v26  ;;  %v1016_v56 = vadd.f32 %v992_v40, %v933_v59 }
 0x1b2   : > { %v1102_v22 = vmax.f32 %v1086_v16, 0.0  ;;  %v1000_v48 = vpop.f32.mrf.mxu0 }
 0x1b4   : > { %1126 = vadd.xlane.f32.xlu0 %v1102_v22 }
 0x1b5   : > { %v912_v32 = vpop.f32.mrf.mxu3 }
 0x1b6   : > { %v934_v57 = vadd.f32 %v912_v32, %v1888_v20 }
 0x1b7   : > { %v1060_v1 = vpop.f32.mrf.mxu1 }
 0x1b8   : > { %v1087_v51 = vadd.f32 %v1060_v1, %v1014_v31  ;;  %v1017_v6 = vadd.f32 %v995_v21, %v934_v57 }
 0x1ba   : > { %v1103_v12 = vmax.f32 %v1087_v51, 0.0  ;;  %v1002_v22 = vpop.f32.mrf.mxu0 }
 0x1bc   : > { %1128 = vadd.xlane.f32.xlu1 %v1103_v12  ;;  %v842_v12 = vpop.xlane.xlu1 %841 }
 0x1bd   : > { %v914_v37 = vpop.f32.mrf.mxu3 }
 0x1be   : > { %v935_v8 = vadd.f32 %v914_v37, %v1892_v24 }
 0x1bf   : > { %v1063_v27 = vpop.f32.mrf.mxu1 }
 0x1c0   : > { %v1088_v52 = vadd.f32 %v1063_v27, %v1015_v33  ;;  %v1018_v20 = vadd.f32 %v997_v19, %v935_v8  ;;  %v840_v33 = vpop.xlane.xlu0 %839 }
 0x1c2   : > { %v1104_v34 = vmax.f32 %v1088_v52, 0.0 }
 0x1c4   : > { %1130 = vadd.xlane.f32.xlu2 %v1104_v34 }
 0x1c5   : > { %v917_v9 = vpop.f32.mrf.mxu3  ;;  %v846_v40 = vpop.xlane.xlu1 %845 }
 0x1c6   : > { %v936_v11 = vadd.f32 %v917_v9, %v1880_v18  ;;  %v783_v18 = vadd.f32 %v1939_v46, %v1929_v35  ;;  %v1098_v35 = vmax.f32 %v2016_v60, 0.0  ;;  %v785_v46 = vadd.f32 %v1959_v61, %v1952_v58 }
 0x1c7   : > { %v1065_v54 = vpop.f32.mrf.mxu1 }
 0x1c8   : > { %v1089_v0 = vadd.f32 %v1065_v54, %v1016_v56  ;;  %v1019_v24 = vadd.f32 %v1000_v48, %v936_v11  ;;  %v799_v50 = vmax.f32 %v783_v18, 0.0  ;;  %v801_v49 = vmax.f32 %v785_v46, 0.0 }
 0x1ca   : > { %v1105_v25 = vmax.f32 %v1089_v0, 0.0 }
 0x1cc   : > { %1132 = vadd.xlane.f32.xlu0 %v1105_v25 }
 0x1cd   : > { %v919_v26 = vpop.f32.mrf.mxu3  ;;  %v830_v52 = vpop.xlane.xlu1 %829 }
 0x1ce   : > { %v937_v2 = vadd.f32 %v919_v26, %v1878_v17  ;;  %v1094_v17 = vmax.f32 %v2007_v38, 0.0  ;;  %v832_v27 = vpop.xlane.xlu2 %831  ;;  %v844_v38 = vpop.xlane.xlu0 %843 }
 0x1cf   : > { %v1068_v3 = vpop.f32.mrf.mxu1 }
 0x1d0   : > { %v1090_v53 = vadd.f32 %v1068_v3, %v1017_v6  ;;  %v1020_v31 = vadd.f32 %v1002_v22, %v937_v2 }
 0x1d2   : > { %v1106_v14 = vmax.f32 %v1090_v53, 0.0 }
 0x1d4   : > { %1120 = vadd.xlane.f32.xlu0 %v1099_v28  ;;  %1134 = vadd.xlane.f32.xlu1 %v1106_v14 }
 0x1d6   : > { %v828_v59 = vpop.xlane.xlu0 %827 }
 0x1d7   : > { %v1070_v10 = vpop.f32.mrf.mxu1 }
 0x1d8   : > { %v1091_v43 = vadd.f32 %v1070_v10, %v1018_v20 }
 0x1da   : > { %v1107_v47 = vmax.f32 %v1091_v43, 0.0 }
 0x1dc   : > { %821 = vadd.xlane.f32.xlu0 %v802_v39  ;;  %823 = vadd.xlane.f32.xlu1 %v803_v36 }
 0x1dd   : > { %1136 = vadd.xlane.f32.xlu2 %v1107_v47 }
 0x1de   : > { %v836_v32 = vpop.xlane.xlu1 %835  ;;  %v834_v21 = vpop.xlane.xlu0 %833 }
 0x1df   : > { %v1073_v13 = vpop.f32.mrf.mxu1 }
 0x1e0   : > { %v1092_v16 = vadd.f32 %v1073_v13, %v1019_v24 }
 0x1e2   : > { %v1108_v7 = vmax.f32 %v1092_v16, 0.0 }
 0x1e4   : > { %1114 = vadd.xlane.f32.xlu0 %v1096_v42  ;;  %1116 = vadd.xlane.f32.xlu1 %v1097_v63 }
 0x1e5   : > { %1138 = vadd.xlane.f32.xlu2 %v1108_v7 }
 0x1e6   : > { %v838_v44 = vpop.xlane.xlu2 %837 }
 0x1e7   : > { %v1075_v30 = vpop.f32.mrf.mxu1 }
 0x1e8   : > { %v1093_v1 = vadd.f32 %v1075_v30, %v1020_v31 }
 0x1ea   : > { %v1109_v51 = vmax.f32 %v1093_v1, 0.0 }
 0x1ec   : > { %815 = vadd.xlane.f32.xlu0 %v799_v50  ;;  %817 = vadd.xlane.f32.xlu1 %v800_v23 }
 0x1ed   : > { %1140 = vadd.xlane.f32.xlu2 %v1109_v51 }
 0x1f4   : > { %1110 = vadd.xlane.f32.xlu1 %v1094_v17 }
 0x1f5   : > { %825 = vadd.xlane.f32.xlu2 %v804_v4 }
 0x1fd   : > { %1118 = vadd.xlane.f32.xlu2 %v1098_v35 }
 0x205   : > { %819 = vadd.xlane.f32.xlu2 %v801_v49 }
 0x20d   : > { %1112 = vadd.xlane.f32.xlu2 %v1095_v55 }
 0x217   : > { %v1123_v60 = vpop.xlane.xlu1 %1122 }
 0x218   : > { %v1148_v26 = vadd.f32 %v1123_v60, %v828_v59  ;;  %v1182_v59 = vld [vmem:[%s2184_s3 + $0x40] sm:$0xff]  ;;  %v1184_v60 = vld [vmem:[%s2184_s3 + $0x50] sm:$0xff] }
 0x21a   : > { %v1164_v2 = vmul.f32 0.00390625, %v1148_v26 }
 0x21f   : > { %v1125_v34 = vpop.xlane.xlu2 %1124 }
 0x220   : > { %v1149_v47 = vadd.f32 %v1125_v34, %v830_v52  ;;  %v1179_v52 = vld [vmem:[%s2184_s3 + $0x28] sm:$0xff] }
 0x221   : > { %v1183_v34 = vld [vmem:[%s2184_s3 + $0x48] sm:$0xff] }
 0x222   : > { %v1165_v16 = vmul.f32 0.00390625, %v1149_v47 }
 0x227   : > { %v1127_v58 = vpop.xlane.xlu0 %1126 }
 0x228   : > { %v1150_v36 = vadd.f32 %v1127_v58, %v832_v27  ;;  %v1177_v27 = vld [vmem:[%s2184_s3 + $0x18] sm:$0xff]  ;;  %v1188_v58 = vld [vmem:[%s2184_s3 + $0x70] sm:$0xff] }
 0x22a   : > { %v1166_v13 = vmul.f32 0.00390625, %v1150_v36  ;;  %v1197_v36 = vld [vmem:[%s2185_s4 + $0x38] sm:$0xff] }
 0x22f   : > { %v1129_v54 = vpop.xlane.xlu1 %1128 }
 0x230   : > { %v1151_v10 = vadd.f32 %v1129_v54, %v834_v21  ;;  %v1185_v21 = vld [vmem:[%s2184_s3 + $0x58] sm:$0xff]  ;;  %v1187_v54 = vld [vmem:[%s2184_s3 + $0x68] sm:$0xff] }
 0x232   : > { %v1167_v39 = vmul.f32 0.00390625, %v1151_v10  ;;  %v1196_v10 = vld [vmem:[%s2185_s4 + $0x30] sm:$0xff] }
 0x237   : > { %v1131_v56 = vpop.xlane.xlu2 %1130 }
 0x238   : > { %v1152_v9 = vadd.f32 %v1131_v56, %v836_v32  ;;  %v1181_v32 = vld [vmem:[%s2184_s3 + $0x38] sm:$0xff]  ;;  %v1186_v56 = vld [vmem:[%s2184_s3 + $0x60] sm:$0xff] }
 0x23a   : > { %v1168_v11 = vmul.f32 0.00390625, %v1152_v9  ;;  %v1195_v9 = vld [vmem:[%s2185_s4 + $0x28] sm:$0xff] }
 0x23f   : > { %v1133_v0 = vpop.xlane.xlu0 %1132 }
 0x240   : > { %v1153_v28 = vadd.f32 %v1133_v0, %v838_v44  ;;  %v1180_v44 = vld [vmem:[%s2184_s3 + $0x30] sm:$0xff] }
 0x242   : > { %v1169_v43 = vmul.f32 0.00390625, %v1153_v28  ;;  %v1194_v28 = vld [vmem:[%s2185_s4 + $0x20] sm:$0xff] }
 0x247   : > { %v1135_v62 = vpop.xlane.xlu1 %1134  ;;  %v1121_v29 = vpop.xlane.xlu0 %1120 }
 0x248   : > { %v1154_v3 = vadd.f32 %v1135_v62, %v840_v33  ;;  %v1176_v33 = vld [vmem:[%s2184_s3 + $0x10] sm:$0xff]  ;;  %v1190_v62 = vld [vmem:[%s2185_s4] sm:$0xff] }
 0x24a   : > { %v1170_v41 = vmul.f32 0.00390625, %v1154_v3 }
 0x24f   : > { %v824_v57 = vpop.xlane.xlu1 %823  ;;  %v822_v48 = vpop.xlane.xlu0 %821 }
 0x250   : > { %v1137_v61 = vpop.xlane.xlu2 %1136 }
 0x251   : > { %v1155_v6 = vadd.f32 %v1137_v61, %v842_v12  ;;  %v1174_v12 = vld [vmem:[%s2184_s3] sm:$0xff]  ;;  %v1189_v61 = vld [vmem:[%s2184_s3 + $0x78] sm:$0xff] }
 0x253   : > { %v1171_v8 = vmul.f32 0.00390625, %v1155_v6 }
 0x257   : > { %v1117_v20 = vpop.xlane.xlu1 %1116  ;;  %v1115_v22 = vpop.xlane.xlu0 %1114 }
 0x258   : > { %v1139_v45 = vpop.xlane.xlu2 %1138  ;;  %v1145_v18 = vadd.f32 %v1117_v20, %v822_v48 }
 0x259   : > { %v1156_v37 = vadd.f32 %v1139_v45, %v844_v38  ;;  %v1178_v38 = vld [vmem:[%s2184_s3 + $0x20] sm:$0xff] }
 0x25a   : > { %v1161_v51 = vmul.f32 0.00390625, %v1145_v18 }
 0x25b   : > { %v1172_v53 = vmul.f32 0.00390625, %v1156_v37 }
 0x25f   : > { %v818_v63 = vpop.xlane.xlu1 %817  ;;  %v816_v17 = vpop.xlane.xlu0 %815 }
 0x260   : > { %v1141_v25 = vpop.xlane.xlu2 %1140 }
 0x261   : > { %v1157_v5 = vadd.f32 %v1141_v25, %v846_v40  ;;  %v1175_v40 = vld [vmem:[%s2184_s3 + $0x8] sm:$0xff] }
 0x263   : > { %v1173_v19 = vmul.f32 0.00390625, %v1157_v5  ;;  %v1192_v5 = vld [vmem:[%s2185_s4 + $0x10] sm:$0xff] }
 0x265   : > { %1206 = vmatpush.msrb.mxu2 %v1173_v19  ;;  %v1193_v19 = vld [vmem:[%s2185_s4 + $0x18] sm:$0xff] }
 0x267   : > { %1207 = vmatpush.msrb.mxu2 %v1172_v53  ;;  %v1111_v23 = vpop.xlane.xlu1 %1110 }
 0x268   : > { %v826_v14 = vpop.xlane.xlu2 %825  ;;  %v1142_v35 = vadd.f32 %v1111_v23, %v816_v17  ;;  %v1204_v17 = vld [vmem:[%s2185_s4 + $0x70] sm:$0xff] }
 0x269   : > { %1208 = vmatpush.msrb.mxu2 %v1171_v8  ;;  %v1147_v42 = vadd.f32 %v1121_v29, %v826_v14 }
 0x26a   : > { %v1158_v55 = vmul.f32 0.00390625, %v1142_v35 }
 0x26b   : > { %1209 = vmatpush.msrb.mxu2 %v1170_v41  ;;  %v1163_v15 = vmul.f32 0.00390625, %v1147_v42 }
 0x26d   : > { %1210 = vmatpush.msrb.mxu2 %v1169_v43 }
 0x26f   : > { %1211 = vmatpush.msrb.mxu2 %v1168_v11 }
 0x270   : > { %v1119_v24 = vpop.xlane.xlu2 %1118 }
 0x271   : > { %1212 = vmatpush.msrb.mxu2 %v1167_v39  ;;  %v1146_v7 = vadd.f32 %v1119_v24, %v824_v57  ;;  %v1191_v57 = vld [vmem:[%s2185_s4 + $0x8] sm:$0xff]  ;;  %v1198_v39 = vld [vmem:[%s2185_s4 + $0x40] sm:$0xff] }
 0x273   : > { %1213 = vmatpush.msrb.mxu2 %v1166_v13  ;;  %v1162_v30 = vmul.f32 0.00390625, %v1146_v7  ;;  %v1199_v13 = vld [vmem:[%s2185_s4 + $0x48] sm:$0xff] }
 0x275   : > { %1214 = vmatpush.msrb.mxu2 %v1165_v16 }
 0x277   : > { %1215 = vmatpush.msrb.mxu2 %v1164_v2 }
 0x278   : > { %v820_v31 = vpop.xlane.xlu2 %819 }
 0x279   : > { %v1144_v1 = vadd.f32 %v1115_v22, %v820_v31  ;;  %1216 = vmatpush.msrb.mxu2 %v1163_v15  ;;  %v1201_v22 = vld [vmem:[%s2185_s4 + $0x58] sm:$0xff]  ;;  %v1202_v31 = vld [vmem:[%s2185_s4 + $0x60] sm:$0xff] }
 0x27b   : > { %1217 = vmatpush.msrb.mxu2 %v1162_v30  ;;  %v1160_v50 = vmul.f32 0.00390625, %v1144_v1 }
 0x27d   : > { %1218 = vmatpush.msrb.mxu2 %v1161_v51  ;;  %v1203_v51 = vld [vmem:[%s2185_s4 + $0x68] sm:$0xff] }
 0x27f   : > { %1219 = vmatpush.msrb.mxu2 %v1160_v50 }
 0x280   : > { %v1113_v4 = vpop.xlane.xlu2 %1112 }
 0x281   : > { %v1143_v46 = vadd.f32 %v1113_v4, %v818_v63  ;;  %v1200_v63 = vld [vmem:[%s2185_s4 + $0x50] sm:$0xff] }
 0x283   : > { %v1159_v49 = vmul.f32 0.00390625, %v1143_v46  ;;  %v1205_v46 = vld [vmem:[%s2185_s4 + $0x78] sm:$0xff] }
 0x285   : > { %1220 = vmatpush.msrb.mxu2 %v1159_v49 }
 0x287   : > { %1221 = vmatpush.msrb.mxu2 %v1158_v55 }
 0x288   : > { %1222 = vmatmul.f32.vlgmr.msrb.gmra.mxu2 %v1174_v12 }
 0x290   : > { %1225 = vmatmul.f32.gmra.mxu2 %v1175_v40 }
 0x298   : > { %1228 = vmatmul.f32.gmra.mxu2 %v1176_v33 }
 0x2a0   : > { %1231 = vmatmul.f32.gmra.mxu2 %v1177_v27 }
 0x2a8   : > { %1234 = vmatmul.f32.gmra.mxu2 %v1178_v38 }
 0x2b0   : > { %1237 = vmatmul.f32.gmra.mxu2 %v1179_v52 }
 0x2b8   : > { %1240 = vmatmul.f32.gmra.mxu2 %v1180_v44 }
 0x2c0   : > { %1243 = vmatmul.f32.gmra.mxu2 %v1181_v32 }
 0x2c8   : > { %1246 = vmatmul.f32.gmra.mxu2 %v1182_v59 }
 0x2d0   : > { %1249 = vmatmul.f32.gmra.mxu2 %v1183_v34 }
 0x2d8   : > { %1252 = vmatmul.f32.gmra.mxu2 %v1184_v60 }
 0x2e0   : > { %1255 = vmatmul.f32.gmra.mxu2 %v1185_v21 }
 0x2e8   : > { %1258 = vmatmul.f32.gmra.mxu2 %v1186_v56 }
 0x2f0   : > { %1261 = vmatmul.f32.gmra.mxu2 %v1187_v54 }
 0x2f8   : > { %1264 = vmatmul.f32.gmra.mxu2 %v1188_v58 }
 0x300   : > { %1267 = vmatmul.f32.gmra.mxu2 %v1189_v61 }
 0x30b   : > { %v1223_v0 = vpop.f32.mrf.mxu2 }
 0x30c   : > { %v1224_v45 = vadd.f32 %v1223_v0, %v1190_v62 }
 0x30e   : > { %1272 = vst.msk [vmem:[%s2099_s30] sm:$0xff] %vm1271_vm4, %v1224_v45 }
 0x313   : > { %v1226_v25 = vpop.f32.mrf.mxu2 }
 0x314   : > { %v1227_v37 = vadd.f32 %v1226_v25, %v1191_v57 }
 0x316   : > { %1273 = vst.msk [vmem:[%s2099_s30 + $0x8] sm:$0xff] %vm1271_vm4, %v1227_v37 }
 0x31b   : > { %v1229_v29 = vpop.f32.mrf.mxu2 }
 0x31c   : > { %v1230_v6 = vadd.f32 %v1229_v29, %v1192_v5 }
 0x31e   : > { %1274 = vst.msk [vmem:[%s2099_s30 + $0x10] sm:$0xff] %vm1271_vm4, %v1230_v6 }
 0x323   : > { %v1232_v3 = vpop.f32.mrf.mxu2 }
 0x324   : > { %v1233_v53 = vadd.f32 %v1232_v3, %v1193_v19 }
 0x326   : > { %1275 = vst.msk [vmem:[%s2099_s30 + $0x18] sm:$0xff] %vm1271_vm4, %v1233_v53 }
 0x32b   : > { %v1235_v8 = vpop.f32.mrf.mxu2 }
 0x32c   : > { %v1236_v14 = vadd.f32 %v1235_v8, %v1194_v28 }
 0x32e   : > { %1276 = vst.msk [vmem:[%s2099_s30 + $0x20] sm:$0xff] %vm1271_vm4, %v1236_v14 }
 0x333   : > { %v1238_v41 = vpop.f32.mrf.mxu2 }
 0x334   : > { %v1239_v20 = vadd.f32 %v1238_v41, %v1195_v9 }
 0x336   : > { %1277 = vst.msk [vmem:[%s2099_s30 + $0x28] sm:$0xff] %vm1271_vm4, %v1239_v20 }
 0x33b   : > { %v1241_v43 = vpop.f32.mrf.mxu2 }
 0x33c   : > { %v1242_v48 = vadd.f32 %v1241_v43, %v1196_v10 }
 0x33e   : > { %1278 = vst.msk [vmem:[%s2099_s30 + $0x30] sm:$0xff] %vm1271_vm4, %v1242_v48 }
 0x343   : > { %v1244_v11 = vpop.f32.mrf.mxu2 }
 0x344   : > { %v1245_v47 = vadd.f32 %v1244_v11, %v1197_v36 }
 0x346   : > { %1279 = vst.msk [vmem:[%s2099_s30 + $0x38] sm:$0xff] %vm1271_vm4, %v1245_v47 }
 0x34b   : > { %v1247_v24 = vpop.f32.mrf.mxu2 }
 0x34c   : > { %v1248_v26 = vadd.f32 %v1247_v24, %v1198_v39 }
 0x34e   : > { %1280 = vst.msk [vmem:[%s2099_s30 + $0x40] sm:$0xff] %vm1271_vm4, %v1248_v26 }
 0x353   : > { %v1250_v16 = vpop.f32.mrf.mxu2 }
 0x354   : > { %v1251_v42 = vadd.f32 %v1250_v16, %v1199_v13 }
 0x356   : > { %1281 = vst.msk [vmem:[%s2099_s30 + $0x48] sm:$0xff] %vm1271_vm4, %v1251_v42 }
 0x35b   : > { %v1253_v2 = vpop.f32.mrf.mxu2 }
 0x35c   : > { %v1254_v7 = vadd.f32 %v1253_v2, %v1200_v63 }
 0x35e   : > { %1282 = vst.msk [vmem:[%s2099_s30 + $0x50] sm:$0xff] %vm1271_vm4, %v1254_v7 }
 0x363   : > { %v1256_v18 = vpop.f32.mrf.mxu2 }
 0x364   : > { %v1257_v15 = vadd.f32 %v1256_v18, %v1201_v22 }
 0x366   : > { %1283 = vst.msk [vmem:[%s2099_s30 + $0x58] sm:$0xff] %vm1271_vm4, %v1257_v15 }
 0x36b   : > { %v1259_v30 = vpop.f32.mrf.mxu2 }
 0x36c   : > { %v1260_v1 = vadd.f32 %v1259_v30, %v1202_v31 }
 0x36e   : > { %1284 = vst.msk [vmem:[%s2099_s30 + $0x60] sm:$0xff] %vm1271_vm4, %v1260_v1 }
 0x373   : > { %v1262_v50 = vpop.f32.mrf.mxu2 }
 0x374   : > { %v1263_v23 = vadd.f32 %v1262_v50, %v1203_v51 }
 0x376   : > { %1285 = vst.msk [vmem:[%s2099_s30 + $0x68] sm:$0xff] %vm1271_vm4, %v1263_v23 }
 0x37b   : > { %v1265_v4 = vpop.f32.mrf.mxu2 }
 0x37c   : > { %v1266_v35 = vadd.f32 %v1265_v4, %v1204_v17 }
 0x37e   : > { %1286 = vst.msk [vmem:[%s2099_s30 + $0x70] sm:$0xff] %vm1271_vm4, %v1266_v35 }
 0x383   : > { %v1268_v49 = vpop.f32.mrf.mxu2 }
 0x384   : > { %v1269_v55 = vadd.f32 %v1268_v49, %v1205_v46 }
 0x386   : > { %1287 = vst.msk [vmem:[%s2099_s30 + $0x78] sm:$0xff] %vm1271_vm4, %v1269_v55 }
 0x387 PF: > { %s15_s18 = sadd.s32 1, %s1608_s18  }
 0x388   : > { %p12_p4 = scmp.ge.s32.totalorder %s15_s18, 4  }
 0x38a   :  { %14 = sbr.rel (!%p12_p4) target bundleno = 1 (0x1), region = 72 }

</bundles_post_ra>
